<compile_context>
chip_gen: v5e
topology: v5e:2x2
jax: 0.10.0
libtpu: 0.0.40
codegen_flags: <defaults>
</compile_context>

<pallas_src>
import functools

import jax
import jax.numpy as jnp
from jax.experimental import pallas as pl
from jax.experimental.pallas import tpu as pltpu


def _seg_head_kernel(x_ref, wpt_ref, bp_ref, q_ref, qt_ref, wct_ref, bc_ref,
                     mask_ref, clst_ref, ctx_acc_ref, *, inv_hw, unroll_proj):
    # x_ref:    (1, Cin, T_HW)  channel-first pixel/point features (this tile)
    # wpt_ref:  (D, Cin)        projection weight, pre-transposed
    # bp_ref:   (D, 1)          projection bias (column)
    # q_ref:    (Q, D)          queries (row-major, for the mask matmul)
    # qt_ref:   (D, Q)          queries transposed (for the class head)
    # wct_ref:  (K, D)          class weight, pre-transposed
    # bc_ref:   (K, 1)          class bias (column)
    # mask_ref: (1, Q, T_HW)    mask logits output tile (lane-dense)
    # clst_ref: (1, K, Q)       class logits output (transposed, resident)
    # ctx_acc_ref: VMEM (D, 1)  cross-HW-tile sum of pixel embeddings
    hw = pl.program_id(1)

    @pl.when(hw == 0)
    def _init():
        ctx_acc_ref[...] = jnp.zeros_like(ctx_acc_ref)

    x = x_ref[0]                  # [Cin, T_HW]  f32
    wpt = wpt_ref[...]            # [D, Cin]
    bp = bp_ref[...]              # [D, 1]
    cin = x.shape[0]

    if unroll_proj:
        # Tiny channel count: VPU broadcast-FMA unrolled over Cin; keeps the
        # MXU free and avoids zero-padding a 7-deep contraction.
        pix = wpt[:, 0:1] * x[0:1, :]
        for c in range(1, cin):
            pix = pix + wpt[:, c:c + 1] * x[c:c + 1, :]
        pix = pix + bp
    else:
        pix = jnp.dot(wpt, x, preferred_element_type=jnp.float32) + bp
    pix = jnp.maximum(pix, 0.0)   # [D, T_HW]  f32

    # Cross-tile accumulation of the global-context sum (column vector, f32).
    ctx_acc_ref[...] += jnp.sum(pix, axis=1, keepdims=True)

    # Mask logits, lane-dense [Q, T_HW]; bf16 MXU operands, f32 accumulate.
    mask = jnp.dot(q_ref[...].astype(jnp.bfloat16),
                   pix.astype(jnp.bfloat16),
                   preferred_element_type=jnp.float32)
    mask_ref[0] = mask.astype(mask_ref.dtype)

    @pl.when(hw == pl.num_programs(1) - 1)
    def _finalize():
        ctx = ctx_acc_ref[...] * inv_hw                     # [D, 1]
        q_ctx_t = qt_ref[...] + ctx                         # [D, Q]
        clst = jnp.dot(wct_ref[...], q_ctx_t,
                       preferred_element_type=jnp.float32)  # [K, Q]
        clst_ref[0] = (clst + bc_ref[...]).astype(clst_ref.dtype)


def _pick_hw_tile(hw, target_rows=2048):
    """Largest multiple of 128 that divides HW and is <= target_rows."""
    if hw % 128 != 0:
        return hw                      # single full block (block == full dim)
    t = min((target_rows // 128) * 128, hw)
    t = max(t, 128)
    while t > 128 and hw % t != 0:
        t -= 128
    return t


def instance_segmentation_forward(x, params, point2segment=None,
                                  raw_coordinates=None, hw_tile=None):
    """x: NCHW [B, C, H, W] float32.

    Returns:
      mask_logits  [B, Q, HW]  (lane-dense; transpose in the consumer if a
                                [B, HW, Q] view is really needed)
      class_logits [B, Q, K]
    """
    del point2segment  # TODO(synk): segment pooling not implemented
    B, C, H, W = x.shape
    HW = H * W

    # Channel-first flatten: NCHW -> [B, C, HW] is a pure reshape (no HBM
    # transpose).  raw_coordinates join on the channel (sublane) axis.
    x_flat = x.reshape(B, C, HW)
    if raw_coordinates is not None:
        rc = raw_coordinates.reshape(B, raw_coordinates.shape[1], HW)
        x_flat = jnp.concatenate([x_flat, rc], axis=1)
    x_flat = x_flat.astype(jnp.float32)
    Cin = x_flat.shape[1]

    w_proj, b_proj, queries, w_cls, b_cls = params
    assert w_proj.shape[0] == Cin, "param/feature channel mismatch"
    D = w_proj.shape[1]
    Q = queries.shape[0]
    K = w_cls.shape[1]

    # Tiny one-time weight layout prep (outside the kernel).
    wpt = w_proj.T.astype(jnp.float32)               # [D, Cin]
    bp = b_proj.reshape(D, 1).astype(jnp.float32)    # [D, 1]
    q = queries.astype(jnp.float32)                  # [Q, D]
    qt = queries.T.astype(jnp.float32)               # [D, Q]
    wct = w_cls.T.astype(jnp.float32)                # [K, D]
    bc = b_cls.reshape(K, 1).astype(jnp.float32)     # [K, 1]

    t_hw = hw_tile if hw_tile is not None else _pick_hw_tile(HW)
    assert HW % t_hw == 0 and (t_hw % 128 == 0 or t_hw == HW), \
        f"bad HW tile {t_hw} for HW={HW}"
    n_hw = HW // t_hw
    grid = (B, n_hw)

    kernel = functools.partial(_seg_head_kernel, inv_hw=1.0 / HW,
                               unroll_proj=(Cin <= 16))

    # Scheduler hint + explicit VMEM cap (generation-safe: <= 48 MiB << v7x 64).
    flops = 2 * B * HW * (Cin * D + D * Q) + 2 * B * Q * D * K
    bytes_accessed = 4 * (B * Cin * HW + B * Q * HW + B * K * Q
                          + Cin * D + D + 2 * Q * D + K * D + K)
    cost = pl.CostEstimate(flops=int(flops), transcendentals=0,
                           bytes_accessed=int(bytes_accessed))

    def _rup(v, m):
        return ((v + m - 1) // m) * m

    tile_bytes = 4 * (_rup(Cin, 8) * t_hw + _rup(Q, 8) * t_hw)       # x + mask
    const_bytes = 4 * 128 * (3 * _rup(D, 8) + _rup(Q, 8) + 3 * _rup(K, 8))
    vmem_limit = int(min(max(4 * (2 * tile_bytes + const_bytes),
                             16 * 1024 * 1024),
                         48 * 1024 * 1024))

    out_shapes = (
        jax.ShapeDtypeStruct((B, Q, HW), jnp.float32),   # mask logits (lane-dense)
        jax.ShapeDtypeStruct((B, K, Q), jnp.float32),    # class logits, transposed
    )

    fn = pl.pallas_call(
        kernel,
        out_shape=out_shapes,
        grid_spec=pltpu.PrefetchScalarGridSpec(
            num_scalar_prefetch=0,
            grid=grid,
            in_specs=[
                pl.BlockSpec((1, Cin, t_hw), lambda b, h: (b, 0, h)),  # x tile
                pl.BlockSpec((D, Cin), lambda b, h: (0, 0)),           # wpt
                pl.BlockSpec((D, 1), lambda b, h: (0, 0)),             # bp
                pl.BlockSpec((Q, D), lambda b, h: (0, 0)),             # q
                pl.BlockSpec((D, Q), lambda b, h: (0, 0)),             # q^T
                pl.BlockSpec((K, D), lambda b, h: (0, 0)),             # wc^T
                pl.BlockSpec((K, 1), lambda b, h: (0, 0)),             # bc
            ],
            out_specs=[
                pl.BlockSpec((1, Q, t_hw), lambda b, h: (b, 0, h)),    # mask tile
                pl.BlockSpec((1, K, Q), lambda b, h: (b, 0, 0)),       # cls^T (resident)
            ],
            scratch_shapes=[pltpu.VMEM((D, 1), jnp.float32)],          # ctx sum
        ),
        compiler_params=pltpu.CompilerParams(
            dimension_semantics=("parallel", "arbitrary"),
            vmem_limit_bytes=vmem_limit),
        cost_estimate=cost,
    )
    mask_logits, cls_t = fn(x_flat, wpt, bp, q, qt, wct, bc)
    class_logits = jnp.transpose(cls_t, (0, 2, 1))   # tiny [B, K, Q] -> [B, Q, K]
    return mask_logits, class_logits


def init_params(key, c_in, d_model, n_queries, n_classes):
    k0, k1, k2, k3 = jax.random.split(key, 4)
    w_proj = (jax.random.normal(k0, (c_in, d_model), jnp.float32)
              * (1.0 / jnp.sqrt(c_in)))
    b_proj = jnp.zeros((1, d_model), jnp.float32)
    queries = jax.random.normal(k1, (n_queries, d_model), jnp.float32) * 0.1
    w_cls = (jax.random.normal(k2, (d_model, n_classes), jnp.float32)
             * (1.0 / jnp.sqrt(d_model)))
    b_cls = (jax.random.normal(k3, (1, n_classes), jnp.float32) * 0.01)
    return (w_proj, b_proj, queries, w_cls, b_cls)


def _reference_forward(x, params, raw_coordinates):
    """Plain-JAX reference (f32) used to validate the tiled kernel."""
    B, C, H, W = x.shape
    HW = H * W
    w_proj, b_proj, queries, w_cls, b_cls = params
    xf = jnp.concatenate([x.reshape(B, C, HW),
                          raw_coordinates.reshape(B, -1, HW)], axis=1)
    xf = jnp.transpose(xf, (0, 2, 1))                          # [B, HW, Cin]
    pix = jnp.maximum(xf @ w_proj + b_proj, 0.0)               # [B, HW, D]
    mask = jnp.einsum('bnd,qd->bqn', pix, queries)             # [B, Q, HW]
    ctx = jnp.mean(pix, axis=1, keepdims=True)                 # [B, 1, D]
    cls = (queries[None] + ctx) @ w_cls + b_cls                # [B, Q, K]
    return mask, cls


if __name__ == "__main__":
    key = jax.random.PRNGKey(0)
    k_x, k_rc, k_p = jax.random.split(key, 3)

    B, C, H, W = 2, 4, 16, 16          # small NCHW input
    D, Q, K = 32, 8, 6                 # hidden, num queries, num classes(+1)

    x = jax.random.normal(k_x, (B, C, H, W), jnp.float32)
    raw_coordinates = jax.random.normal(k_rc, (B, 3, H, W), jnp.float32)

    params = init_params(k_p, C + 3, D, Q, K)  # +3 channels for raw coords

    # hw_tile=128 forces 2 HW tiles per batch, exercising the pipelined grid
    # axis and the cross-tile context accumulator at demo scale.
    mask_logits, class_logits = instance_segmentation_forward(
        x, params, point2segment=None, raw_coordinates=raw_coordinates,
        hw_tile=128)
    jax.block_until_ready((mask_logits, class_logits))

    assert mask_logits.shape == (B, Q, H * W)
    assert class_logits.shape == (B, Q, K)

    # Numeric check vs. plain-JAX reference (mask matmul uses bf16 MXU
    # operands -> loose tolerance; class head is f32 end-to-end).
    ref_mask, ref_cls = _reference_forward(x, params, raw_coordinates)
    assert jnp.allclose(mask_logits, ref_mask, rtol=5e-2, atol=5e-2), \
        "mask logits mismatch"
    assert jnp.allclose(class_logits, ref_cls, rtol=1e-3, atol=1e-3), \
        "class logits mismatch"

    print("KERNEL_OK")
</pallas_src>

<mosaic_0001>
module attributes {stable_mosaic.version = 11 : i64} {
  func.func @_seg_head_kernel(%arg0: i32, %arg1: i32, %arg2: memref<1x7x128xf32, #tpu.memory_space<vmem>>, %arg3: memref<32x7xf32, #tpu.memory_space<vmem>>, %arg4: memref<32x1xf32, #tpu.memory_space<vmem>>, %arg5: memref<8x32xf32, #tpu.memory_space<vmem>>, %arg6: memref<32x8xf32, #tpu.memory_space<vmem>>, %arg7: memref<6x32xf32, #tpu.memory_space<vmem>>, %arg8: memref<6x1xf32, #tpu.memory_space<vmem>>, %arg9: memref<1x8x128xf32, #tpu.memory_space<vmem>>, %arg10: memref<1x6x8xf32, #tpu.memory_space<vmem>>, %arg11: memref<32x1xf32, #tpu.memory_space<vmem>>) attributes {dimension_semantics = [#tpu.dimension_semantics<parallel>, #tpu.dimension_semantics<arbitrary>], iteration_bounds = array<i64: 2, 2>, scalar_prefetch = 0 : i64, scratch_operands = 1 : i64, tpu.core_type = #tpu.core_type<tc>, window_params = [{transform_indices = @transform_0, window_bounds = array<i64: 1, 7, 128>}, {pipeline_mode = #tpu.pipeline_mode<synchronous>, transform_indices = @transform_1, window_bounds = array<i64: 32, 7>}, {pipeline_mode = #tpu.pipeline_mode<synchronous>, transform_indices = @transform_2, window_bounds = array<i64: 32, 1>}, {pipeline_mode = #tpu.pipeline_mode<synchronous>, transform_indices = @transform_3, window_bounds = array<i64: 8, 32>}, {pipeline_mode = #tpu.pipeline_mode<synchronous>, transform_indices = @transform_4, window_bounds = array<i64: 32, 8>}, {pipeline_mode = #tpu.pipeline_mode<synchronous>, transform_indices = @transform_5, window_bounds = array<i64: 6, 32>}, {pipeline_mode = #tpu.pipeline_mode<synchronous>, transform_indices = @transform_6, window_bounds = array<i64: 6, 1>}, {transform_indices = @transform_7, window_bounds = array<i64: 1, 8, 128>}, {transform_indices = @transform_8, window_bounds = array<i64: 1, 6, 8>}]} {
    %c0_i32 = arith.constant 0 : i32
    %0 = arith.cmpi eq, %arg1, %c0_i32 : i32
    %1 = arith.extui %0 : i1 to i32
    %c0_i32_0 = arith.constant 0 : i32
    %2 = arith.cmpi ne, %1, %c0_i32_0 : i32
    scf.if %2 {
      %cst_19 = arith.constant 0.000000e+00 : f32
      %67 = vector.broadcast %cst_19 : f32 to vector<32x1xf32>
      %c0_20 = arith.constant 0 : index
      %c0_21 = arith.constant 0 : index
      %68 = vector.load %arg11[%c0_20, %c0_21] : memref<32x1xf32, #tpu.memory_space<vmem>>, vector<32x1xf32>
      tpu.vector_store %arg11[%c0_20, %c0_21], %67 {strides = array<i32>} : memref<32x1xf32, #tpu.memory_space<vmem>>, vector<32x1xf32>,
    } else {
    }
    %c0 = arith.constant 0 : index
    %c0_1 = arith.constant 0 : index
    %c0_2 = arith.constant 0 : index
    %3 = vector.load %arg2[%c0, %c0_1, %c0_2] : memref<1x7x128xf32, #tpu.memory_space<vmem>>, vector<1x7x128xf32>
    %4 = vector.shape_cast %3 : vector<1x7x128xf32> to vector<7x128xf32>
    %c0_3 = arith.constant 0 : index
    %c0_4 = arith.constant 0 : index
    %5 = vector.load %arg3[%c0_3, %c0_4] : memref<32x7xf32, #tpu.memory_space<vmem>>, vector<32x7xf32>
    %c0_5 = arith.constant 0 : index
    %c0_6 = arith.constant 0 : index
    %6 = vector.load %arg4[%c0_5, %c0_6] : memref<32x1xf32, #tpu.memory_space<vmem>>, vector<32x1xf32>
    %7 = vector.extract_strided_slice %5 {offsets = [0, 0], sizes = [32, 1], strides = [1, 1]} : vector<32x7xf32> to vector<32x1xf32>
    %8 = vector.extract_strided_slice %4 {offsets = [0, 0], sizes = [1, 128], strides = [1, 1]} : vector<7x128xf32> to vector<1x128xf32>
    %9 = vector.broadcast %7 : vector<32x1xf32> to vector<32x128xf32>
    %10 = vector.broadcast %8 : vector<1x128xf32> to vector<32x128xf32>
    %11 = arith.mulf %9, %10 : vector<32x128xf32>
    %12 = vector.extract_strided_slice %5 {offsets = [0, 1], sizes = [32, 1], strides = [1, 1]} : vector<32x7xf32> to vector<32x1xf32>
    %13 = vector.extract_strided_slice %4 {offsets = [1, 0], sizes = [1, 128], strides = [1, 1]} : vector<7x128xf32> to vector<1x128xf32>
    %14 = vector.broadcast %12 : vector<32x1xf32> to vector<32x128xf32>
    %15 = vector.broadcast %13 : vector<1x128xf32> to vector<32x128xf32>
    %16 = arith.mulf %14, %15 : vector<32x128xf32>
    %17 = arith.addf %11, %16 : vector<32x128xf32>
    %18 = vector.extract_strided_slice %5 {offsets = [0, 2], sizes = [32, 1], strides = [1, 1]} : vector<32x7xf32> to vector<32x1xf32>
    %19 = vector.extract_strided_slice %4 {offsets = [2, 0], sizes = [1, 128], strides = [1, 1]} : vector<7x128xf32> to vector<1x128xf32>
    %20 = vector.broadcast %18 : vector<32x1xf32> to vector<32x128xf32>
    %21 = vector.broadcast %19 : vector<1x128xf32> to vector<32x128xf32>
    %22 = arith.mulf %20, %21 : vector<32x128xf32>
    %23 = arith.addf %17, %22 : vector<32x128xf32>
    %24 = vector.extract_strided_slice %5 {offsets = [0, 3], sizes = [32, 1], strides = [1, 1]} : vector<32x7xf32> to vector<32x1xf32>
    %25 = vector.extract_strided_slice %4 {offsets = [3, 0], sizes = [1, 128], strides = [1, 1]} : vector<7x128xf32> to vector<1x128xf32>
    %26 = vector.broadcast %24 : vector<32x1xf32> to vector<32x128xf32>
    %27 = vector.broadcast %25 : vector<1x128xf32> to vector<32x128xf32>
    %28 = arith.mulf %26, %27 : vector<32x128xf32>
    %29 = arith.addf %23, %28 : vector<32x128xf32>
    %30 = vector.extract_strided_slice %5 {offsets = [0, 4], sizes = [32, 1], strides = [1, 1]} : vector<32x7xf32> to vector<32x1xf32>
    %31 = vector.extract_strided_slice %4 {offsets = [4, 0], sizes = [1, 128], strides = [1, 1]} : vector<7x128xf32> to vector<1x128xf32>
    %32 = vector.broadcast %30 : vector<32x1xf32> to vector<32x128xf32>
    %33 = vector.broadcast %31 : vector<1x128xf32> to vector<32x128xf32>
    %34 = arith.mulf %32, %33 : vector<32x128xf32>
    %35 = arith.addf %29, %34 : vector<32x128xf32>
    %36 = vector.extract_strided_slice %5 {offsets = [0, 5], sizes = [32, 1], strides = [1, 1]} : vector<32x7xf32> to vector<32x1xf32>
    %37 = vector.extract_strided_slice %4 {offsets = [5, 0], sizes = [1, 128], strides = [1, 1]} : vector<7x128xf32> to vector<1x128xf32>
    %38 = vector.broadcast %36 : vector<32x1xf32> to vector<32x128xf32>
    %39 = vector.broadcast %37 : vector<1x128xf32> to vector<32x128xf32>
    %40 = arith.mulf %38, %39 : vector<32x128xf32>
    %41 = arith.addf %35, %40 : vector<32x128xf32>
    %42 = vector.extract_strided_slice %5 {offsets = [0, 6], sizes = [32, 1], strides = [1, 1]} : vector<32x7xf32> to vector<32x1xf32>
    %43 = vector.extract_strided_slice %4 {offsets = [6, 0], sizes = [1, 128], strides = [1, 1]} : vector<7x128xf32> to vector<1x128xf32>
    %44 = vector.broadcast %42 : vector<32x1xf32> to vector<32x128xf32>
    %45 = vector.broadcast %43 : vector<1x128xf32> to vector<32x128xf32>
    %46 = arith.mulf %44, %45 : vector<32x128xf32>
    %47 = arith.addf %41, %46 : vector<32x128xf32>
    %48 = vector.broadcast %6 : vector<32x1xf32> to vector<32x128xf32>
    %49 = arith.addf %47, %48 : vector<32x128xf32>
    %cst = arith.constant 0.000000e+00 : f32
    %50 = vector.broadcast %cst : f32 to vector<32x128xf32>
    %51 = arith.maximumf %49, %50 : vector<32x128xf32>
    %c0_7 = arith.constant 0 : index
    %c0_8 = arith.constant 0 : index
    %52 = vector.load %arg11[%c0_7, %c0_8] : memref<32x1xf32, #tpu.memory_space<vmem>>, vector<32x1xf32>
    %cst_9 = arith.constant dense<0.000000e+00> : vector<32xf32>
    %53 = vector.multi_reduction <add>, %51, %cst_9 [1] : vector<32x128xf32> to vector<32xf32>
    %54 = vector.shape_cast %53 : vector<32xf32> to vector<32x1xf32>
    %55 = arith.addf %52, %54 : vector<32x1xf32>
    %c0_10 = arith.constant 0 : index
    %c0_11 = arith.constant 0 : index
    %56 = vector.load %arg11[%c0_10, %c0_11] : memref<32x1xf32, #tpu.memory_space<vmem>>, vector<32x1xf32>
    tpu.vector_store %arg11[%c0_10, %c0_11], %55 {strides = array<i32>} : memref<32x1xf32, #tpu.memory_space<vmem>>, vector<32x1xf32>,
    %c0_12 = arith.constant 0 : index
    %c0_13 = arith.constant 0 : index
    %57 = vector.load %arg5[%c0_12, %c0_13] : memref<8x32xf32, #tpu.memory_space<vmem>>, vector<8x32xf32>
    %58 = arith.truncf %57 : vector<8x32xf32> to vector<8x32xbf16>
    %59 = arith.truncf %51 : vector<32x128xf32> to vector<32x128xbf16>
    %cst_14 = arith.constant dense<0.000000e+00> : vector<8x128xf32>
    %60 = tpu.matmul %58, %59, %cst_14 {dimension_numbers = #tpu.dot_dimension_numbers<[1], [0], [0], [1], [0, 0, 1, 1], [], []>} : vector<8x32xbf16>, vector<32x128xbf16>, vector<8x128xf32> -> vector<8x128xf32>
    %c0_15 = arith.constant 0 : index
    %c0_16 = arith.constant 0 : index
    %c0_17 = arith.constant 0 : index
    %61 = vector.load %arg9[%c0_15, %c0_16, %c0_17] : memref<1x8x128xf32, #tpu.memory_space<vmem>>, vector<1x8x128xf32>
    %62 = vector.shape_cast %61 : vector<1x8x128xf32> to vector<8x128xf32>
    %63 = vector.shape_cast %60 : vector<8x128xf32> to vector<1x8x128xf32>
    tpu.vector_store %arg9[%c0_15, %c0_16, %c0_17], %63 {strides = array<i32>} : memref<1x8x128xf32, #tpu.memory_space<vmem>>, vector<1x8x128xf32>,
    %c1_i32 = arith.constant 1 : i32
    %64 = arith.cmpi eq, %arg1, %c1_i32 : i32
    %65 = arith.extui %64 : i1 to i32
    %c0_i32_18 = arith.constant 0 : i32
    %66 = arith.cmpi ne, %65, %c0_i32_18 : i32
    scf.if %66 {
      %c0_19 = arith.constant 0 : index
      %c0_20 = arith.constant 0 : index
      %67 = vector.load %arg11[%c0_19, %c0_20] : memref<32x1xf32, #tpu.memory_space<vmem>>, vector<32x1xf32>
      %cst_21 = arith.constant 3.906250e-03 : f32
      %68 = vector.broadcast %cst_21 : f32 to vector<32x1xf32>
      %69 = arith.mulf %67, %68 : vector<32x1xf32>
      %c0_22 = arith.constant 0 : index
      %c0_23 = arith.constant 0 : index
      %70 = vector.load %arg6[%c0_22, %c0_23] : memref<32x8xf32, #tpu.memory_space<vmem>>, vector<32x8xf32>
      %71 = vector.broadcast %69 : vector<32x1xf32> to vector<32x8xf32>
      %72 = arith.addf %70, %71 : vector<32x8xf32>
      %c0_24 = arith.constant 0 : index
      %c0_25 = arith.constant 0 : index
      %73 = vector.load %arg7[%c0_24, %c0_25] : memref<6x32xf32, #tpu.memory_space<vmem>>, vector<6x32xf32>
      %cst_26 = arith.constant dense<0.000000e+00> : vector<6x8xf32>
      %74 = tpu.matmul %73, %72, %cst_26 {dimension_numbers = #tpu.dot_dimension_numbers<[1], [0], [0], [1], [0, 0, 1, 1], [], []>} : vector<6x32xf32>, vector<32x8xf32>, vector<6x8xf32> -> vector<6x8xf32>
      %c0_27 = arith.constant 0 : index
      %c0_28 = arith.constant 0 : index
      %75 = vector.load %arg8[%c0_27, %c0_28] : memref<6x1xf32, #tpu.memory_space<vmem>>, vector<6x1xf32>
      %76 = vector.broadcast %75 : vector<6x1xf32> to vector<6x8xf32>
      %77 = arith.addf %74, %76 : vector<6x8xf32>
      %c0_29 = arith.constant 0 : index
      %c0_30 = arith.constant 0 : index
      %c0_31 = arith.constant 0 : index
      %78 = vector.load %arg10[%c0_29, %c0_30, %c0_31] : memref<1x6x8xf32, #tpu.memory_space<vmem>>, vector<1x6x8xf32>
      %79 = vector.shape_cast %78 : vector<1x6x8xf32> to vector<6x8xf32>
      %80 = vector.shape_cast %77 : vector<6x8xf32> to vector<1x6x8xf32>
      tpu.vector_store %arg10[%c0_29, %c0_30, %c0_31], %80 {strides = array<i32>} : memref<1x6x8xf32, #tpu.memory_space<vmem>>, vector<1x6x8xf32>,
    } else {
    }
    return
  }
  func.func @transform_0(%arg0: i32, %arg1: i32) -> (i32, i32, i32) {
    %c0_i32 = arith.constant 0 : i32
    %c0_i32_0 = arith.constant 0 : i32
    return %arg0, %c0_i32, %arg1 : i32, i32, i32
  }
  func.func @transform_1(%arg0: i32, %arg1: i32) -> (i32, i32) {
    %c0_i32 = arith.constant 0 : i32
    %c0_i32_0 = arith.constant 0 : i32
    %c0_i32_1 = arith.constant 0 : i32
    return %c0_i32, %c0_i32_0 : i32, i32
  }
  func.func @transform_2(%arg0: i32, %arg1: i32) -> (i32, i32) {
    %c0_i32 = arith.constant 0 : i32
    %c0_i32_0 = arith.constant 0 : i32
    %c0_i32_1 = arith.constant 0 : i32
    return %c0_i32, %c0_i32_0 : i32, i32
  }
  func.func @transform_3(%arg0: i32, %arg1: i32) -> (i32, i32) {
    %c0_i32 = arith.constant 0 : i32
    %c0_i32_0 = arith.constant 0 : i32
    %c0_i32_1 = arith.constant 0 : i32
    return %c0_i32, %c0_i32_0 : i32, i32
  }
  func.func @transform_4(%arg0: i32, %arg1: i32) -> (i32, i32) {
    %c0_i32 = arith.constant 0 : i32
    %c0_i32_0 = arith.constant 0 : i32
    %c0_i32_1 = arith.constant 0 : i32
    return %c0_i32, %c0_i32_0 : i32, i32
  }
  func.func @transform_5(%arg0: i32, %arg1: i32) -> (i32, i32) {
    %c0_i32 = arith.constant 0 : i32
    %c0_i32_0 = arith.constant 0 : i32
    %c0_i32_1 = arith.constant 0 : i32
    return %c0_i32, %c0_i32_0 : i32, i32
  }
  func.func @transform_6(%arg0: i32, %arg1: i32) -> (i32, i32) {
    %c0_i32 = arith.constant 0 : i32
    %c0_i32_0 = arith.constant 0 : i32
    %c0_i32_1 = arith.constant 0 : i32
    return %c0_i32, %c0_i32_0 : i32, i32
  }
  func.func @transform_7(%arg0: i32, %arg1: i32) -> (i32, i32, i32) {
    %c0_i32 = arith.constant 0 : i32
    %c0_i32_0 = arith.constant 0 : i32
    return %arg0, %c0_i32, %arg1 : i32, i32, i32
  }
  func.func @transform_8(%arg0: i32, %arg1: i32) -> (i32, i32, i32) {
    %c0_i32 = arith.constant 0 : i32
    %c0_i32_0 = arith.constant 0 : i32
    %c0_i32_1 = arith.constant 0 : i32
    return %arg0, %c0_i32, %c0_i32_0 : i32, i32, i32
  }
}

</mosaic_0001>

<bundles_post_ra>
// kernel: tpu_custom_call.1
= control target key start
LH: loop header
LB: loop body
LE: loop exit
PB: predicated region body
PF: predicated region fallthrough
CT: control target
= control target key end

     0   :  { %14 = vsyncpa [#allocation4], 0  ;;  %s1273_s0 = inlined_call_operand.vmem [shape: f32[2,7,256], index: 0, kind: input, shape index: {}]   ;;  %s1274_s1 = inlined_call_operand.vmem [shape: f32[32,7], index: 1, kind: input, shape index: {}]   ;;  %s1275_s2 = inlined_call_operand.vmem [shape: f32[32,1], index: 2, kind: input, shape index: {}]   ;;  %s1276_s3 = inlined_call_operand.vmem [shape: f32[8,32], index: 3, kind: input, shape index: {}]   ;;  %s1277_s4 = inlined_call_operand.vmem [shape: f32[32,8], index: 4, kind: input, shape index: {}]   ;;  %s1278_s5 = inlined_call_operand.vmem [shape: f32[6,32], index: 5, kind: input, shape index: {}]   ;;  %s1279_s6 = inlined_call_operand.vmem [shape: f32[6,1], index: 6, kind: input, shape index: {}]   ;;  %s1280_s7 = inlined_call_operand.hbm [shape: f32[2,8,256], index: 7, kind: output, shape index: {0}]   ;;  %s1281_s8 = inlined_call_operand.vmem [shape: f32[2,6,8], index: 8, kind: output, shape index: {1}]  }
   0x1   :  { %16 = vsyncpa [#allocation4 + $0x1], 0  ;;  %s1079_s27 = smov 0   ;;  %s1081_s28 = smov 0  }
   0x2   :  { %s1083_s29 = smov 0   ;;  %s1085_s30 = smov 0  }
   0x3   :  { %s1087_s9 = smov 0   ;;  %s1089_s10 = smov 0  }
   0x4   :  { %s1091_s11 = smov 0   ;;  %s1093_s12 = smov 0  }
   0x5 LB: > { %1287 = sst [smem:[#allocation6_spill]] %s1015_s10  ;;  %s804_s13 = sadd.s32 4294967295, %s1023_s12   ;;  %s1023_s12 = sphi %s1093_s12, %s22_s12   ;;  %s1019_s11 = sphi %s1091_s11, %s1299_s11   ;;  %s1015_s10 = sphi %s1089_s10, %s1298_s10   ;;  %s1011_s9 = sphi %s1087_s9, %s1297_s9   ;;  %s1007_s30 = sphi %s1085_s30, %s1296_s30   ;;  %s1003_s29 = sphi %s1083_s29, %s1302_s29   ;;  %s999_s28 = sphi %s1081_s28, %s1301_s28   ;;  %s995_s27 = sphi %s1079_s27, %s1300_s27  }
   0x6   : > { %1288 = sst [smem:[#allocation7_spill]] %s1019_s11  ;;  %s805_s14 = sadd.s32 4294967294, %s1023_s12  }
   0x7   : > { %s31_s15 = sadd.s32 1, %s1015_s10  ;;  %s34_s16 = sadd.s32 1, %s1019_s11 }
   0x8   : > { %p32_p0 = scmp.ge.s32.totalorder %s31_s15, 2  ;;  %p207_p1 = scmp.ne.s32.totalorder %s1003_s29, %s999_s28 }
   0x9   : > { %p208_p2 = scmp.eq.s32.totalorder %s804_s13, 3  ;;  %p213_p5 = scmp.ne.s32.totalorder %s999_s28, %s995_s27 }
   0xa   : > { %s1304_s15 = smov (%p32_p0, %s31_s15), 0  ;;  %s1306_s16 = smov (!%p32_p0, %s34_s16), %s1019_s11 }
   0xb   : > { %1289 = sst [smem:[#allocation8_spill]] %s1304_s15  ;;  %s193_s17 = ssub.s32 %s1015_s10, %s1304_s15 }
   0xc   : > { %p1130_p3 = por %p208_p2, %p207_p1  ;;  %p36_p4 = scmp.ge.s32.totalorder %s1306_s16, 2 }
   0xd   : > { %p214_p6 = scmp.eq.s32.totalorder %s805_s14, 3  ;;  %p808_p7 = scmp.ge.s32.totalorder %s1023_s12, 1 }
   0xe   : > { %s1308_s16 = smov (%p36_p4, %s1306_s16), 0  ;;  %p287_p9 = scmp.lt.s32.totalorder %s1023_s12, 5 }
   0xf   : > { %1291 = sst [smem:[#allocation9_spill]] %s1308_s16  ;;  %p1139_p8 = por %p214_p6, %p213_p5 }
  0x10   : > { %s192_s20 = ssub.s32 %s1019_s11, %s1308_s16  ;;  %s197_s21 = sadd.s32 1, %s1003_s29 }
  0x11   : > { %s194_s22 = sor.u32 %s193_s17, %s192_s20  ;;  %p288_p10 = pnand %p808_p7, %p287_p9 }
  0x12   : > { %p195_p11 = scmp.eq.s32.totalorder %s194_s22, 0  ;;  %s1286_s24 = sand.u32 (!%p288_p10), 1, %s999_s28  }
  0x13   : > { %291 = sbr.rel (%p288_p10) target bundleno = 675 (0x2a3), region = 48  ;;  %p328_p12 = scmp.lt.s32.totalorder (!%p288_p10), %s1011_s9, 1 }
  0x14   : > { %s1148_s23 = scalar_select %p195_p11, %s1003_s29, %s197_s21  }
  0x15   : > { %s1154_s25 = sshll.u32 (!%p288_p10), %s1286_s24, 3  ;;  %p330_p13 = scmp.lt.s32.totalorder (!%p288_p10), %s1007_s30, 1 }
  0x16   : > { %1293 = sst [smem:[#allocation10_spill]] %s1148_s23  ;;  %s321_s24 = scalar_lea.vmem (!%p288_p10), [#allocation3], %s1154_s25 }
  0x17   : > { %p813_p0 = scmp.ne.s32.totalorder (!%p288_p10), %s1007_s30, 0 }
  0x18   : > { %s329_s26 = scalar_select %p328_p12, %s1011_s9, 1 }
  0x19   : > { %s331_s13 = scalar_select %p330_p13, %s1007_s30, 1 }
  0x1a   : > { %s810_s14 = sshll.u32 %s329_s26, 1  ;;  %s812_s17 = sshll.u32 %s329_s26, 3 }
  0x1b   : > { %s333_s20 = sadd.s32 %s810_s14, %s331_s13  ;;  %s1162_s16 = scalar_lea.vmem %s1281_s8, %s812_s17 }
  0x1c   : > { %s811_s15 = sshll.u32 %s333_s20, 3  ;;  %344 = sbr.rel (%p813_p0) target bundleno = 38 (0x26), region = 52 }
  0x1d   : > { %s1167_s23 = scalar_lea.vmem %s1273_s0, %s811_s15 }
  0x21   : > { %vm345_vm0 = vcmask 7168   ;;  %v1025_v0 = vmov 0.0  }
  0x22   : > { %346 = vst.msk [vmem:[#allocation2] sm:$0xff] %vm345_vm0, %v1025_v0 }
  0x23   : > { %347 = vst.msk [vmem:[#allocation2 + $0x8] sm:$0xff] %vm345_vm0, %v1025_v0 }
  0x24   : > { %348 = vst.msk [vmem:[#allocation2 + $0x10] sm:$0xff] %vm345_vm0, %v1025_v0 }
  0x25   : > { %349 = vst.msk [vmem:[#allocation2 + $0x18] sm:$0xff] %vm345_vm0, %v1025_v0 }
  0x26 PF: > { %v353_v1 = vld [vmem:[%s1274_s1 + $0x10] sm:$0xff]  ;;  %v351_v2 = vld [vmem:[%s1274_s1] sm:$0xff]  ;;  %v1026_v3 = vmov 1   ;;  %v1027_v4 = vmov 0   ;;  %v354_v5 = vld [vmem:[%s1274_s1 + $0x18] sm:$0xff]  ;;  %v1028_v7 = vmov 2  }
  0x27   : > { %904 = vset.pattern.permute.xlu2 %v1026_v3  ;;  %903 = vset.pattern.permute.xlu1 %v1027_v4  ;;  %v352_v6 = vld [vmem:[%s1274_s1 + $0x8] sm:$0xff]  ;;  %v1029_v8 = vmov 3   ;;  %v1030_v9 = vmov 4   ;;  %v1031_v10 = vmov 5   ;;  %v1032_v11 = vmov 6   ;;  %v358_v12 = vld [vmem:[%s1275_s2 + $0x18] sm:$0xff] }
  0x28   : > { %902 = vset.pattern.permute.xlu0 %v1027_v4  ;;  %393 = vperm.xlu2 %904, %v353_v1   ;;  %v357_v13 = vld [vmem:[%s1275_s2 + $0x10] sm:$0xff]  ;;  %v356_v15 = vld [vmem:[%s1275_s2 + $0x8] sm:$0xff]  ;;  %v355_v16 = vld [vmem:[%s1275_s2] sm:$0xff]  ;;  %vm587_vm1 = vcmask 261120   ;;  %vm578_vm2 = vcmask 7168   ;;  %p815_p1 = scmp.ne.s32.totalorder %s1007_s30, 1 }
  0x29   : > { %371 = vperm.xlu1 %903, %v353_v1   ;;  %361 = vperm.xlu0 %902, %v351_v2   ;;  %v350_v18 = vld [vmem:[%s1167_s23] sm:$0x7f] }
  0x2a   : > { %v400_v19 = vperm.slane %v350_v18, 1  ;;  %v379_v21 = vperm.slane %v350_v18, 0  ;;  %v425_v45 = vperm.slane %v350_v18, 2  ;;  %v450_v51 = vperm.slane %v350_v18, 3 }
  0x2b   : > { %v475_v59 = vperm.slane %v350_v18, 4  ;;  %v500_v63 = vperm.slane %v350_v18, 5 }
  0x30   : > { %397 = vperm.xlu2 %904, %v354_v5  }
  0x31   : > { %376 = vperm.xlu1 %903, %v354_v5   ;;  %366 = vperm.xlu0 %902, %v352_v6  }
  0x38   : > { %385 = vperm.xlu2 %904, %v351_v2  }
  0x39   : > { %906 = vset.pattern.permute.xlu1 %v1028_v7  ;;  %905 = vset.pattern.permute.xlu0 %v1028_v7 }
  0x3a   : > { %422 = vperm.xlu1 %906, %v354_v5   ;;  %418 = vperm.xlu0 %905, %v353_v1  }
  0x40   : > { %908 = vset.pattern.permute.xlu2 %v1029_v8 }
  0x41   : > { %443 = vperm.xlu2 %908, %v353_v1  }
  0x42   : > { %907 = vset.pattern.permute.xlu1 %v1026_v3  ;;  %909 = vset.pattern.permute.xlu0 %v1029_v8 }
  0x43   : > { %389 = vperm.xlu1 %907, %v352_v6   ;;  %447 = vperm.xlu0 %909, %v354_v5  }
  0x49   : > { %911 = vset.pattern.permute.xlu2 %v1028_v7 }
  0x4a   : > { %414 = vperm.xlu2 %911, %v352_v6  }
  0x4b   : > { %910 = vset.pattern.permute.xlu1 %v1028_v7  ;;  %435 = vperm.xlu0 %909, %v351_v2  }
  0x4c   : > { %410 = vperm.xlu1 %910, %v351_v2  }
  0x52   : > { %913 = vset.pattern.permute.xlu2 %v1030_v9 }
  0x53   : > { %916 = vset.pattern.permute.xlu0 %v1031_v10  ;;  %472 = vperm.xlu2 %913, %v354_v5  }
  0x54   : > { %912 = vset.pattern.permute.xlu1 %v1030_v9  ;;  %497 = vperm.xlu0 %916, %v354_v5  }
  0x55   : > { %468 = vperm.xlu1 %912, %v353_v1  }
  0x5b   : > { %915 = vset.pattern.permute.xlu2 %v1031_v10 }
  0x5c   : > { %493 = vperm.xlu2 %915, %v353_v1   ;;  %485 = vperm.xlu0 %916, %v351_v2  }
  0x5d   : > { %914 = vset.pattern.permute.xlu1 %v1029_v8 }
  0x5e   : > { %439 = vperm.xlu1 %914, %v352_v6  }
  0x64   : > { %918 = vset.pattern.permute.xlu2 %v1030_v9  ;;  %922 = vset.pattern.permute.xlu0 %v1032_v11 }
  0x65   : > { %464 = vperm.xlu2 %918, %v352_v6   ;;  %514 = vperm.xlu0 %922, %v352_v6  }
  0x66   : > { %917 = vset.pattern.permute.xlu1 %v1030_v9 }
  0x67   : > { %460 = vperm.xlu1 %917, %v351_v2  }
  0x6d   : > { %920 = vset.pattern.permute.xlu2 %v1032_v11  ;;  %925 = vset.pattern.permute.xlu0 %v1027_v4 }
  0x6e   : > { %522 = vperm.xlu2 %920, %v354_v5  }
  0x6f   : > { %919 = vset.pattern.permute.xlu1 %v1032_v11 }
  0x70   : > { %518 = vperm.xlu1 %919, %v353_v1  }
  0x76   : > { %510 = vperm.xlu2 %920, %v351_v2  }
  0x78   : > { %921 = vset.pattern.permute.xlu1 %v1031_v10 }
  0x79   : > { %489 = vperm.xlu1 %921, %v352_v6  }
  0x7e   : > { %924 = vset.pattern.permute.xlu2 %v1027_v4 }
  0x7f   : > { %551 = vperm.xlu2 %924, %v358_v12  }
  0x81   : > { %923 = vset.pattern.permute.xlu1 %v1027_v4 }
  0x82   : > { %546 = vperm.xlu1 %923, %v357_v13   ;;  %v394_v14 = vpop.permute.xlu2 %393  ;;  %v525_v13 = vperm.slane %v350_v18, 6 }
  0x83   : > { %v403_v22 = vmul.f32 %v400_v19, %v394_v14 }
  0x87   : > { %541 = vperm.xlu2 %924, %v356_v15  }
  0x8a   : > { %536 = vperm.xlu1 %923, %v355_v16   ;;  %v398_v17 = vpop.permute.xlu2 %397 }
  0x8b   : > { %v404_v50 = vmul.f32 %v400_v19, %v398_v17 }
  0x92   : > { %v386_v20 = vpop.permute.xlu2 %385 }
  0x93   : > { %v401_v0 = vmul.f32 %v400_v19, %v386_v20 }
  0x9b   : > { %v372_v23 = vpop.permute.xlu1 %371  ;;  %v444_v26 = vpop.permute.xlu2 %443 }
  0x9c   : > { %v382_v24 = vmul.f32 %v379_v21, %v372_v23  ;;  %v362_v28 = vpop.permute.xlu0 %361  ;;  %v453_v3 = vmul.f32 %v450_v51, %v444_v26 }
  0x9d   : > { %v380_v1 = vmul.f32 %v379_v21, %v362_v28 }
  0x9e   : > { %v407_v25 = vadd.f32 %v403_v22, %v382_v24 }
  0x9f   : > { %v405_v15 = vadd.f32 %v401_v0, %v380_v1 }
  0xa3   : > { %v377_v27 = vpop.permute.xlu1 %376 }
  0xa4   : > { %v415_v29 = vpop.permute.xlu2 %414  ;;  %v367_v31 = vpop.permute.xlu0 %366  ;;  %v383_v49 = vmul.f32 %v379_v21, %v377_v27 }
  0xa5   : > { %v381_v47 = vmul.f32 %v379_v21, %v367_v31  ;;  %v427_v54 = vmul.f32 %v425_v45, %v415_v29 }
  0xa6   : > { %v408_v57 = vadd.f32 %v404_v50, %v383_v49 }
  0xac   : > { %v423_v30 = vpop.permute.xlu1 %422  ;;  %v419_v34 = vpop.permute.xlu0 %418 }
  0xad   : > { %v473_v32 = vpop.permute.xlu2 %472  ;;  %v429_v52 = vmul.f32 %v425_v45, %v423_v30  ;;  %v428_v58 = vmul.f32 %v425_v45, %v419_v34 }
  0xae   : > { %v479_v5 = vmul.f32 %v475_v59, %v473_v32 }
  0xaf   : > { %v433_v62 = vadd.f32 %v429_v52, %v408_v57  ;;  %v432_v4 = vadd.f32 %v428_v58, %v407_v25 }
  0xb1   : > { %v457_v22 = vadd.f32 %v453_v3, %v432_v4 }
  0xb5   : > { %v390_v33 = vpop.permute.xlu1 %389  ;;  %v448_v37 = vpop.permute.xlu0 %447 }
  0xb6   : > { %v494_v36 = vpop.permute.xlu2 %493  ;;  %v402_v48 = vmul.f32 %v400_v19, %v390_v33  ;;  %v454_v60 = vmul.f32 %v450_v51, %v448_v37 }
  0xb7   : > { %v503_v16 = vmul.f32 %v500_v63, %v494_v36 }
  0xb8   : > { %v406_v55 = vadd.f32 %v402_v48, %v381_v47  ;;  %v458_v6 = vadd.f32 %v454_v60, %v433_v62  ;;  %v565_v62 = vld [vmem:[#allocation2 + $0x18] sm:$0xff] }
  0xba   : > { %v431_v2 = vadd.f32 %v427_v54, %v406_v55  ;;  %v483_v17 = vadd.f32 %v479_v5, %v458_v6 }
  0xbd   : > { %v436_v40 = vpop.permute.xlu0 %435 }
  0xbe   : > { %v411_v35 = vpop.permute.xlu1 %410  ;;  %v451_v19 = vmul.f32 %v450_v51, %v436_v40 }
  0xbf   : > { %v465_v39 = vpop.permute.xlu2 %464  ;;  %v426_v10 = vmul.f32 %v425_v45, %v411_v35 }
  0xc0   : > { %v477_v8 = vmul.f32 %v475_v59, %v465_v39 }
  0xc1   : > { %v430_v25 = vadd.f32 %v426_v10, %v405_v15 }
  0xc3   : > { %v455_v18 = vadd.f32 %v451_v19, %v430_v25 }
  0xc6   : > { %v498_v43 = vpop.permute.xlu0 %497 }
  0xc7   : > { %v469_v38 = vpop.permute.xlu1 %468  ;;  %v504_v11 = vmul.f32 %v500_v63, %v498_v43 }
  0xc8   : > { %v523_v42 = vpop.permute.xlu2 %522  ;;  %v478_v12 = vmul.f32 %v475_v59, %v469_v38 }
  0xc9   : > { %v508_v26 = vadd.f32 %v504_v11, %v483_v17  ;;  %v529_v28 = vmul.f32 %v525_v13, %v523_v42 }
  0xca   : > { %v482_v27 = vadd.f32 %v478_v12, %v457_v22 }
  0xcb   : > { %v533_v34 = vadd.f32 %v529_v28, %v508_v26 }
  0xcc   : > { %v507_v35 = vadd.f32 %v503_v16, %v482_v27 }
  0xce   : > { %v486_v53 = vpop.permute.xlu0 %485 }
  0xcf   : > { %v501_v39 = vmul.f32 %v500_v63, %v486_v53  ;;  %v583_v53 = vld [vmem:[%s1276_s3] sm:$0xff] }
  0xd0   : > { %v440_v41 = vpop.permute.xlu1 %439  ;;  %v1196_v46 = vpop.permute.xlu2 %510 }
  0xd1   : > { %v452_v61 = vmul.f32 %v450_v51, %v440_v41  ;;  %v526_v47 = vmul.f32 %v525_v13, %v1196_v46  ;;  %v563_v46 = vld [vmem:[#allocation2 + $0x8] sm:$0xff] }
  0xd3   : > { %v456_v9 = vadd.f32 %v452_v61, %v431_v2 }
  0xd5   : > { %v481_v20 = vadd.f32 %v477_v8, %v456_v9 }
  0xd7   : > { %v515_v14 = vpop.permute.xlu0 %514 }
  0xd8   : > { %v527_v24 = vmul.f32 %v525_v13, %v515_v14 }
  0xd9   : > { %v461_v44 = vpop.permute.xlu1 %460  ;;  %v552_v7 = vpop.permute.xlu2 %551 }
  0xda   : > { %v476_v30 = vmul.f32 %v475_v59, %v461_v44  ;;  %v557_v38 = vadd.f32 %v552_v7, %v533_v34  ;;  %v564_v59 = vld [vmem:[#allocation2 + $0x10] sm:$0xff] }
  0xdc   : > { %v480_v37 = vadd.f32 %v476_v30, %v455_v18  ;;  %v561_v42 = vmax.f32 %v557_v38, 0.0 }
  0xde   : > { %v505_v48 = vadd.f32 %v501_v39, %v480_v37 }
  0xe0   : > { %v530_v50 = vadd.f32 %v526_v47, %v505_v48 }
  0xe1   : > { %v542_v32 = vpop.permute.xlu2 %541 }
  0xe2   : > { %v519_v56 = vpop.permute.xlu1 %518 }
  0xe3   : > { %v528_v31 = vmul.f32 %v525_v13, %v519_v56  ;;  %v584_v56 = vpack.c.bf16 %v583_v53, %v583_v53 }
  0xe5   : > { %v532_v40 = vadd.f32 %v528_v31, %v507_v35 }
  0xeb   : > { %v490_v23 = vpop.permute.xlu1 %489 }
  0xec   : > { %v502_v21 = vmul.f32 %v500_v63, %v490_v23  ;;  %v562_v63 = vld [vmem:[#allocation2] sm:$0xff] }
  0xee   : > { %v506_v29 = vadd.f32 %v502_v21, %v481_v20 }
  0xf0   : > { %v531_v33 = vadd.f32 %v527_v24, %v506_v29 }
  0xf2   : > { %v555_v36 = vadd.f32 %v542_v32, %v531_v33 }
  0xf4   : > { %v559_v41 = vmax.f32 %v555_v36, 0.0  ;;  %v547_v43 = vpop.permute.xlu1 %546 }
  0xf5   : > { %v556_v45 = vadd.f32 %v547_v43, %v532_v40 }
  0xf6   : > { %568 = vadd.xlane.f32.xlu1 %v559_v41 }
  0xf7   : > { %v560_v44 = vmax.f32 %v556_v45, 0.0 }
  0xf9   : > { %570 = vadd.xlane.f32.xlu2 %v560_v44  ;;  %v586_v49 = vpack.c.bf16 %v561_v42, %v560_v44 }
  0xfb   : > { %597 = vmatpush.bf16.msra.mxu0 %v586_v49 }
  0xfc   : > { %v537_v51 = vpop.permute.xlu1 %536 }
  0xfd   : > { %v554_v52 = vadd.f32 %v537_v51, %v530_v50 }
  0xff   : > { %v558_v54 = vmax.f32 %v554_v52, 0.0 }
 0x101   : > { %572 = vadd.xlane.f32.xlu2 %v561_v42  ;;  %566 = vadd.xlane.f32.xlu0 %v558_v54  ;;  %v585_v55 = vpack.c.bf16 %v559_v41, %v558_v54 }
 0x103   : > { %598 = vmatpush.bf16.msra.mxu0 %v585_v55 }
 0x106   : > { %814 = vmatmul.msk.bf16.vlgmr.msra.gmra.mxu0 %vm587_vm1, %v584_v56 }
 0x169   : > { %v569_v57 = vpop.xlane.xlu1 %568 }
 0x16a   : > { %v575_v58 = vadd.f32 %v569_v57, %v563_v46 }
 0x16c   : > { %580 = vst.msk [vmem:[#allocation2 + $0x8] sm:$0xff] %vm578_vm2, %v575_v58  ;;  %v571_v60 = vpop.xlane.xlu2 %570 }
 0x16d   : > { %v576_v61 = vadd.f32 %v571_v60, %v564_v59 }
 0x16f   : > { %581 = vst.msk [vmem:[#allocation2 + $0x10] sm:$0xff] %vm578_vm2, %v576_v61 }
 0x174   : > { %v573_v0 = vpop.xlane.xlu2 %572  ;;  %v567_v1 = vpop.xlane.xlu0 %566 }
 0x175   : > { %v577_v2 = vadd.f32 %v573_v0, %v565_v62  ;;  %v574_v3 = vadd.f32 %v567_v1, %v562_v63 }
 0x177   : > { %582 = vst.msk [vmem:[#allocation2 + $0x18] sm:$0xff] %vm578_vm2, %v577_v2 }
 0x178   : > { %579 = vst.msk [vmem:[#allocation2] sm:$0xff] %vm578_vm2, %v574_v3 }
 0x183   : > { %v600_v4 = vpop.f32.mrf.mxu0 }
 0x184   : > { %604 = vst [vmem:[%s321_s24] sm:$0xff] %v600_v4 }
 0x187   : > { %608 = sbr.rel (%p815_p1) target bundleno = 658 (0x292), region = 56 }
 0x18b   : > { %v602_v5 = vpop.f32.mrf.mxu0 }
 0x18c   : > { %v612_v6 = vld [vmem:[#allocation2 + $0x18] sm:$0xff]  ;;  %v610_v7 = vld [vmem:[#allocation2 + $0x8] sm:$0xff]  ;;  %v1033_v8 = vmov 0   ;;  %v611_v11 = vld [vmem:[#allocation2 + $0x10] sm:$0xff]  ;;  %vm675_vm3 = vcmask 62464  }
 0x18d   : > { %927 = vset.pattern.permute.xlu1 %v1033_v8  ;;  %926 = vset.pattern.permute.xlu0 %v1033_v8  ;;  %v616_v9 = vmul.f32 0.00390625, %v612_v6  ;;  %v614_v10 = vmul.f32 0.00390625, %v610_v7  ;;  %v609_v12 = vld [vmem:[#allocation2] sm:$0xff]  ;;  %v615_v13 = vmul.f32 0.00390625, %v611_v11  ;;  %v620_v16 = vld [vmem:[%s1277_s4 + $0x18] sm:$0xff]  ;;  %v619_v19 = vld [vmem:[%s1277_s4 + $0x10] sm:$0xff] }
 0x18e   : > { %928 = vset.pattern.permute.xlu2 %v1033_v8  ;;  %v613_v14 = vmul.f32 0.00390625, %v609_v12  ;;  %v646_v15 = vld [vmem:[%s1279_s6] sm:$0x3f]  ;;  %v618_v20 = vld [vmem:[%s1277_s4 + $0x8] sm:$0xff] }
 0x18f   : > { %638 = vperm.xlu0 %926, %v616_v9   ;;  %628 = vperm.xlu1 %927, %v614_v10   ;;  %v617_v25 = vld [vmem:[%s1277_s4] sm:$0xff] }
 0x190   : > { %649 = vperm.xlu2 %928, %v646_v15   ;;  %v645_v29 = vld [vmem:[%s1278_s5] sm:$0x3f] }
 0x197   : > { %633 = vperm.xlu0 %926, %v615_v13   ;;  %623 = vperm.xlu1 %927, %v613_v14  }
 0x1ea   : > { %v650_v30 = vpop.permute.xlu2 %649 }
 0x201   : > { %v639_v17 = vpop.permute.xlu0 %638  ;;  %v629_v22 = vpop.permute.xlu1 %628 }
 0x202   : > { %v644_v23 = vadd.f32 %v639_v17, %v620_v16  ;;  %v642_v27 = vadd.f32 %v629_v22, %v618_v20 }
 0x204   : > { %667 = vmatpush.msra.mxu0 %v644_v23 }
 0x209   : > { %v634_v21 = vpop.permute.xlu0 %633  ;;  %v624_v26 = vpop.permute.xlu1 %623 }
 0x20a   : > { %v643_v24 = vadd.f32 %v634_v21, %v619_v19  ;;  %v641_v28 = vadd.f32 %v624_v26, %v617_v25 }
 0x20c   : > { %668 = vmatpush.msra.mxu0 %v643_v24 }
 0x20e   : > { %669 = vmatpush.msra.mxu0 %v642_v27 }
 0x210   : > { %670 = vmatpush.msra.mxu0 %v641_v28 }
 0x211   : > { %816 = vmatmul.msk.f32.vlgmr.msra.gmra.mxu0 %vm587_vm1, %v645_v29 }
 0x28e   : > { %v672_v31 = vpop.f32.mrf.mxu0 }
 0x28f   : > { %v673_v32 = vadd.f32 %v672_v31, %v650_v30 }
 0x291   : > { %676 = vst.msk [vmem:[%s1162_s16] sm:$0x3f] %vm675_vm3, %v673_v32 }
 0x292 PF: > { %s818_s21 = sshll.u32 %s1011_s9, 1  ;;  %s696_s26 = sshll.u32 %s321_s24, 4  ;;  %s697_s26 = int_to_ptr.vmem [resolvable:$true] %s696_s26 }
 0x293   : > { %s692_s22 = sadd.s32 %s1007_s30, %s818_s21  ;;  %s1294_s23 = sand.u32 1, %s999_s28  }
 0x294   : > { %s819_s13 = sshll.u32 %s692_s22, 3  ;;  %s678_s16 = scalar_lea.sflag [#allocation4], %s1294_s23 }
 0x295   : > { %s694_s10 = scalar_lea.hbm %s1280_s7, %s819_s13  ;;  %s949_s24 = scalar_lea.hbm %s1280_s7, 32 }
 0x296   : > { %s698_s11 = sshll.u32 %s694_s10, 4  ;;  %s699_s11 = int_to_ptr.hbm [resolvable:$true] %s698_s11 }
 0x297   : > { %s943_s15 = sshra.s32 %s699_s11, 4  ;;  %s944_s15 = int_to_ptr.hbm [resolvable:$true] %s943_s15 }
 0x298   : > { %s945_s20 = scalar_lea.hbm %s944_s15, 8  ;;  %p950_p6 = scmp.lt.s32.totalorder %s944_s15, %s1280_s7 }
 0x299   : > { %p946_p2 = scmp.ne.s32.totalorder %s944_s15, %s945_s20  ;;  %p951_p7 = scmp.lt.s32.totalorder %s949_s24, %s945_s20 }
 0x29b   : > { %p947_p4 = pnand %p946_p2, %p1130_p3  ;;  %p952_p9 = por %p951_p7, %p950_p6 }
 0x29d   : > { %p948_p5 = pneg %p947_p4 }
 0x29f   : > { %p953_p10 = pnand %p952_p9, %p948_p5 }
 0x2a1   : > { %956 = shalt.err (!%p953_p10)
}
 0x2a2   : > { %822 = dma.vmem_to_hbm [thread:$0]  (%p1130_p3), %s697_s26, 128, %s699_s11, %s678_s16  }
 0x2a3 PF: > { %p828_p11 = scmp.ge.s32.totalorder %s1023_s12, 2  ;;  %s713_s22 = sand.u32 1, %s995_s27  }
 0x2a4   : > { %s714_s13 = scalar_lea.sflag [#allocation4], %s713_s22 }
 0x2a5   : > { %p825_p12 = pnand %p828_p11, %p1139_p8 }
 0x2a7   : > { %p826_p13 = pneg %p825_p12 }
 0x2a9   : > { %990 = dma.done.wait (%p826_p13), %s714_s13, 128  }
 0x2aa   : > { %992 = vsyncadd (%p826_p13), %s714_s13, 4294967168  ;;  %s22_s12 = sadd.s32 1, %s1023_s12   ;;  %s1295_s14 = sld [smem:[#allocation10_spill]] }
 0x2ab   : > { %p19_p0 = scmp.ge.s32.totalorder %s22_s12, 6   ;;  %s1296_s30 = sld [smem:[#allocation6_spill]] }
 0x2ac   : > { %s1297_s9 = sld [smem:[#allocation7_spill]]  ;;  %s1300_s27 = smov %s999_s28 }
 0x2ad   : > { %s1298_s10 = sld [smem:[#allocation8_spill]]  ;;  %s1301_s28 = smov %s1003_s29 }
 0x2ae   : > { %s1299_s11 = sld [smem:[#allocation9_spill]]  ;;  %21 = sbr.rel (!%p19_p0) target bundleno = 5 (0x5), region = 103 }
 0x2b0   : > { %s1302_s29 = smov %s1295_s14 }
 0x2b3   :  { %727 = vsyncpa [#allocation4], 1 }
 0x2b4   :  { %729 = vsyncpa [#allocation4 + $0x1], 1 }

</bundles_post_ra>
